<compile_context>
chip_gen: v7x
topology: tpu7x:2x2x1
jax: 0.10.0
libtpu: 0.0.40
codegen_flags: <defaults>
</compile_context>

<pallas_src>
import functools
import math

import jax
import jax.numpy as jnp
from jax.experimental import pallas as pl
from jax.experimental.pallas import tpu as pltpu

INPUT_SIZE = 16
IN_FEATURES = 3 * 3 * INPUT_SIZE     # fc1 input = 144
K_PAD = 256                          # contraction dim padded to 128-multiple
HIDDEN = 1024
OUT = 10
OUT_PAD = 128                        # lane-dense output / fc2 N dim
DROP_P = 0.2
MAX_B_TILE = 256                     # rows per grid step (v7x-VMEM safe)


def _round_up(n, m):
    return (n + m - 1) // m * m


def dense_dropout_kernel(*refs, training):
    if training:
        (x_ref, m_in_ref, m_h_ref,
         w1_ref, b1_ref, w2_ref, b2_ref, out_ref) = refs
    else:
        (x_ref, w1_ref, b1_ref, w2_ref, b2_ref, out_ref) = refs

    x = x_ref[...]                                   # (bt, K_PAD) f32
    if training:
        # pre-scaled keep mask: 0 or 1/(1-p)
        x = x * m_in_ref[...]

    # fc1 (bf16 MXU, f32 accumulation) + ReLU
    h = jnp.dot(x.astype(jnp.bfloat16), w1_ref[...],
                preferred_element_type=jnp.float32) + b1_ref[...]
    h = jnp.maximum(h, 0.0)
    if training:
        h = h * m_h_ref[...]

    # fc2 (lane-dense N = 128, padded columns are zero weights/bias)
    logits = jnp.dot(h.astype(jnp.bfloat16), w2_ref[...],
                     preferred_element_type=jnp.float32) + b2_ref[...]

    # mask padded logits so they contribute nothing to the softmax
    col = jax.lax.broadcasted_iota(jnp.int32, logits.shape, 1)
    logits = jnp.where(col < OUT, logits, -jnp.inf)

    # softmax along the feature (last) dim — matches F.softmax(x) on 2-D input
    m = jnp.max(logits, axis=-1, keepdims=True)
    e = jnp.exp(logits - m)
    denom = jnp.sum(e, axis=-1, keepdims=True)
    out_ref[...] = (e / denom).astype(out_ref.dtype)


@functools.partial(jax.jit, static_argnames=("training",))
def simple_dense_net_dropout(x, prepared_params, dropout_key, training=True):
    w1, b1, w2, b2 = prepared_params                 # already padded / bf16
    B = x.shape[0]

    b_tile = min(MAX_B_TILE, _round_up(B, 8))
    B_pad = _round_up(B, b_tile)
    grid = (B_pad // b_tile,)

    # pad batch rows and K columns with zeros (zeros are inert through the net)
    x_p = jnp.zeros((B_pad, K_PAD), jnp.float32).at[:B, :IN_FEATURES].set(
        x.astype(jnp.float32))

    def row_spec(cols):
        return pl.BlockSpec((b_tile, cols), lambda i: (i, 0))

    def pinned(r, c):
        return pl.BlockSpec((r, c), lambda i: (0, 0))

    kernel = functools.partial(dense_dropout_kernel, training=training)

    in_specs = [row_spec(K_PAD)]
    args = [x_p]

    if training:
        # TODO(synk): dropout randomness comes from host-side jax.random
        # (threefry) instead of the in-kernel TPU hardware PRNG
        # (pltpu.prng_seed has no CPU-interpret lowering); only the
        # distribution matches torch's dropout, not the bit stream.
        k_in, k_h = jax.random.split(dropout_key)
        scale = 1.0 / (1.0 - DROP_P)
        m_in = jax.random.bernoulli(
            k_in, 1.0 - DROP_P, (B_pad, K_PAD)).astype(jnp.float32) * scale
        m_h = jax.random.bernoulli(
            k_h, 1.0 - DROP_P, (B_pad, HIDDEN)).astype(jnp.float32) * scale
        in_specs += [row_spec(K_PAD), row_spec(HIDDEN)]
        args += [m_in, m_h]

    in_specs += [
        pinned(K_PAD, HIDDEN),    # w1 (bf16), VMEM-resident across grid
        pinned(1, HIDDEN),        # b1 (f32)
        pinned(HIDDEN, OUT_PAD),  # w2 (bf16)
        pinned(1, OUT_PAD),       # b2 (f32)
    ]
    args += [w1, b1, w2, b2]

    out = pl.pallas_call(
        kernel,
        out_shape=jax.ShapeDtypeStruct((B_pad, OUT_PAD), jnp.float32),
        grid=grid,
        in_specs=in_specs,
        out_specs=pl.BlockSpec((b_tile, OUT_PAD), lambda i: (i, 0)),
        compiler_params=pltpu.CompilerParams(
            dimension_semantics=("parallel",),
            vmem_limit_bytes=32 * 1024 * 1024),
    )(*args)

    return out[:B, :OUT]


def init_params(key):
    """nn.Linear-style init U(-1/sqrt(fan_in), 1/sqrt(fan_in)), logical shapes."""
    k1, k2, k3, k4 = jax.random.split(key, 4)
    b1_bound = 1.0 / math.sqrt(IN_FEATURES)
    b2_bound = 1.0 / math.sqrt(HIDDEN)
    w1 = jax.random.uniform(k1, (IN_FEATURES, HIDDEN), jnp.float32, -b1_bound, b1_bound)
    b1 = jax.random.uniform(k2, (1, HIDDEN), jnp.float32, -b1_bound, b1_bound)
    w2 = jax.random.uniform(k3, (HIDDEN, OUT), jnp.float32, -b2_bound, b2_bound)
    b2 = jax.random.uniform(k4, (1, OUT), jnp.float32, -b2_bound, b2_bound)
    return w1, b1, w2, b2


def prepare_params(params):
    """Pad K->256 / OUT->128 and cast weights to bf16 once (amortized across calls)."""
    w1, b1, w2, b2 = params
    w1p = jnp.zeros((K_PAD, HIDDEN), jnp.float32).at[:IN_FEATURES].set(w1)
    w2p = jnp.zeros((HIDDEN, OUT_PAD), jnp.float32).at[:, :OUT].set(w2)
    b2p = jnp.zeros((1, OUT_PAD), jnp.float32).at[:, :OUT].set(b2)
    return (w1p.astype(jnp.bfloat16), b1.astype(jnp.float32),
            w2p.astype(jnp.bfloat16), b2p)


def _reference_eval(x, prepared_params):
    """Pure-JAX reference (eval mode), same bf16-input / f32-accum matmuls."""
    w1, b1, w2, b2 = prepared_params
    x_p = jnp.zeros((x.shape[0], K_PAD), jnp.float32).at[:, :IN_FEATURES].set(x)
    h = jnp.maximum(
        jnp.dot(x_p.astype(jnp.bfloat16), w1, preferred_element_type=jnp.float32) + b1,
        0.0)
    logits = jnp.dot(h.astype(jnp.bfloat16), w2,
                     preferred_element_type=jnp.float32) + b2
    return jax.nn.softmax(logits[:, :OUT], axis=-1)


if __name__ == "__main__":
    root = jax.random.PRNGKey(0)
    k_params, k_x, k_drop = jax.random.split(root, 3)

    params = init_params(k_params)
    prepared = prepare_params(params)

    B = 8
    x = jax.random.normal(k_x, (B, IN_FEATURES), jnp.float32)

    # Eval mode (dropout = identity): deterministic, check against pure-JAX reference.
    out_eval = jax.block_until_ready(
        simple_dense_net_dropout(x, prepared, k_drop, training=False))
    ref = _reference_eval(x, prepared)
    assert out_eval.shape == (B, OUT)
    assert jnp.allclose(out_eval, ref, atol=2e-3, rtol=2e-3), \
        float(jnp.max(jnp.abs(out_eval - ref)))
    assert jnp.allclose(jnp.sum(out_eval, axis=-1), 1.0, atol=1e-5)

    # Training mode (dropout active, module default state).
    out_train = jax.block_until_ready(
        simple_dense_net_dropout(x, prepared, k_drop, training=True))
    assert out_train.shape == (B, OUT)
    assert bool(jnp.all(jnp.isfinite(out_train)))
    assert jnp.allclose(jnp.sum(out_train, axis=-1), 1.0, atol=1e-5)

    print("KERNEL_OK")
</pallas_src>

<mosaic_0001>
module attributes {stable_mosaic.version = 11 : i64} {
  func.func @dense_dropout_kernel(%arg0: i32, %arg1: memref<8x256xf32, #tpu.memory_space<vmem>>, %arg2: memref<256x1024xbf16, #tpu.memory_space<vmem>>, %arg3: memref<1x1024xf32, #tpu.memory_space<vmem>>, %arg4: memref<1024x128xbf16, #tpu.memory_space<vmem>>, %arg5: memref<1x128xf32, #tpu.memory_space<vmem>>, %arg6: memref<8x128xf32, #tpu.memory_space<vmem>>) attributes {dimension_semantics = [#tpu.dimension_semantics<parallel>], iteration_bounds = array<i64: 1>, scalar_prefetch = 0 : i64, scratch_operands = 0 : i64, tpu.core_type = #tpu.core_type<tc>, window_params = [{transform_indices = @transform_0, window_bounds = array<i64: 8, 256>}, {pipeline_mode = #tpu.pipeline_mode<synchronous>, transform_indices = @transform_1, window_bounds = array<i64: 256, 1024>}, {pipeline_mode = #tpu.pipeline_mode<synchronous>, transform_indices = @transform_2, window_bounds = array<i64: 1, 1024>}, {pipeline_mode = #tpu.pipeline_mode<synchronous>, transform_indices = @transform_3, window_bounds = array<i64: 1024, 128>}, {pipeline_mode = #tpu.pipeline_mode<synchronous>, transform_indices = @transform_4, window_bounds = array<i64: 1, 128>}, {transform_indices = @transform_5, window_bounds = array<i64: 8, 128>}]} {
    %c0 = arith.constant 0 : index
    %c0_0 = arith.constant 0 : index
    %0 = vector.load %arg1[%c0, %c0_0] : memref<8x256xf32, #tpu.memory_space<vmem>>, vector<8x256xf32>
    %1 = arith.truncf %0 : vector<8x256xf32> to vector<8x256xbf16>
    %c0_1 = arith.constant 0 : index
    %c0_2 = arith.constant 0 : index
    %2 = vector.load %arg2[%c0_1, %c0_2] : memref<256x1024xbf16, #tpu.memory_space<vmem>>, vector<256x1024xbf16>
    %cst = arith.constant dense<0.000000e+00> : vector<8x1024xf32>
    %3 = tpu.matmul %1, %2, %cst {dimension_numbers = #tpu.dot_dimension_numbers<[1], [0], [0], [1], [0, 0, 1, 1], [], []>} : vector<8x256xbf16>, vector<256x1024xbf16>, vector<8x1024xf32> -> vector<8x1024xf32>
    %c0_3 = arith.constant 0 : index
    %c0_4 = arith.constant 0 : index
    %4 = vector.load %arg3[%c0_3, %c0_4] : memref<1x1024xf32, #tpu.memory_space<vmem>>, vector<1x1024xf32>
    %5 = vector.broadcast %4 : vector<1x1024xf32> to vector<8x1024xf32>
    %6 = arith.addf %3, %5 : vector<8x1024xf32>
    %cst_5 = arith.constant 0.000000e+00 : f32
    %7 = vector.broadcast %cst_5 : f32 to vector<8x1024xf32>
    %8 = arith.maximumf %6, %7 : vector<8x1024xf32>
    %9 = arith.truncf %8 : vector<8x1024xf32> to vector<8x1024xbf16>
    %c0_6 = arith.constant 0 : index
    %c0_7 = arith.constant 0 : index
    %10 = vector.load %arg4[%c0_6, %c0_7] : memref<1024x128xbf16, #tpu.memory_space<vmem>>, vector<1024x128xbf16>
    %cst_8 = arith.constant dense<0.000000e+00> : vector<8x128xf32>
    %11 = tpu.matmul %9, %10, %cst_8 {dimension_numbers = #tpu.dot_dimension_numbers<[1], [0], [0], [1], [0, 0, 1, 1], [], []>} : vector<8x1024xbf16>, vector<1024x128xbf16>, vector<8x128xf32> -> vector<8x128xf32>
    %c0_9 = arith.constant 0 : index
    %c0_10 = arith.constant 0 : index
    %12 = vector.load %arg5[%c0_9, %c0_10] : memref<1x128xf32, #tpu.memory_space<vmem>>, vector<1x128xf32>
    %13 = vector.broadcast %12 : vector<1x128xf32> to vector<8x128xf32>
    %14 = arith.addf %11, %13 : vector<8x128xf32>
    %15 = tpu.iota {dimensions = array<i32: 1>} : vector<8x128xi32>
    %c10_i32 = arith.constant 10 : i32
    %16 = vector.broadcast %c10_i32 : i32 to vector<8x128xi32>
    %17 = arith.cmpi slt, %15, %16 : vector<8x128xi32>
    %cst_11 = arith.constant 0xFF800000 : f32
    %18 = vector.broadcast %cst_11 : f32 to vector<8x128xf32>
    %19 = arith.select %17, %14, %18 : vector<8x128xi1>, vector<8x128xf32>
    %cst_12 = arith.constant dense<0xFF800000> : vector<8xf32>
    %20 = vector.multi_reduction <maximumf>, %19, %cst_12 [1] : vector<8x128xf32> to vector<8xf32>
    %21 = vector.shape_cast %20 : vector<8xf32> to vector<8x1xf32>
    %22 = vector.broadcast %21 : vector<8x1xf32> to vector<8x128xf32>
    %23 = arith.subf %19, %22 : vector<8x128xf32>
    %24 = math.exp %23 : vector<8x128xf32>
    %cst_13 = arith.constant dense<0.000000e+00> : vector<8xf32>
    %25 = vector.multi_reduction <add>, %24, %cst_13 [1] : vector<8x128xf32> to vector<8xf32>
    %26 = vector.shape_cast %25 : vector<8xf32> to vector<8x1xf32>
    %27 = vector.broadcast %26 : vector<8x1xf32> to vector<8x128xf32>
    %28 = arith.divf %24, %27 : vector<8x128xf32>
    %c0_14 = arith.constant 0 : index
    %c0_15 = arith.constant 0 : index
    %29 = vector.load %arg6[%c0_14, %c0_15] : memref<8x128xf32, #tpu.memory_space<vmem>>, vector<8x128xf32>
    tpu.vector_store %arg6[%c0_14, %c0_15], %28 {strides = array<i32>} : memref<8x128xf32, #tpu.memory_space<vmem>>, vector<8x128xf32>,
    return
  }
  func.func @transform_0(%arg0: i32) -> (i32, i32) {
    %c0_i32 = arith.constant 0 : i32
    %c0_i32_0 = arith.constant 0 : i32
    return %arg0, %c0_i32 : i32, i32
  }
  func.func @transform_1(%arg0: i32) -> (i32, i32) {
    %c0_i32 = arith.constant 0 : i32
    %c0_i32_0 = arith.constant 0 : i32
    %c0_i32_1 = arith.constant 0 : i32
    return %c0_i32, %c0_i32_0 : i32, i32
  }
  func.func @transform_2(%arg0: i32) -> (i32, i32) {
    %c0_i32 = arith.constant 0 : i32
    %c0_i32_0 = arith.constant 0 : i32
    %c0_i32_1 = arith.constant 0 : i32
    return %c0_i32, %c0_i32_0 : i32, i32
  }
  func.func @transform_3(%arg0: i32) -> (i32, i32) {
    %c0_i32 = arith.constant 0 : i32
    %c0_i32_0 = arith.constant 0 : i32
    %c0_i32_1 = arith.constant 0 : i32
    return %c0_i32, %c0_i32_0 : i32, i32
  }
  func.func @transform_4(%arg0: i32) -> (i32, i32) {
    %c0_i32 = arith.constant 0 : i32
    %c0_i32_0 = arith.constant 0 : i32
    %c0_i32_1 = arith.constant 0 : i32
    return %c0_i32, %c0_i32_0 : i32, i32
  }
  func.func @transform_5(%arg0: i32) -> (i32, i32) {
    %c0_i32 = arith.constant 0 : i32
    %c0_i32_0 = arith.constant 0 : i32
    return %arg0, %c0_i32 : i32, i32
  }
}

</mosaic_0001>

<bundles_post_ra>
// kernel: simple_dense_net_dropout.1
= control target key start
LH: loop header
LB: loop body
LE: loop exit
PB: predicated region body
PF: predicated region fallthrough
CT: control target
= control target key end

     0   :  { %10 = vsyncpa [#allocation3], 0  ;;  %s2300_s0 = inlined_call_operand.vmem [shape: f32[8,256], index: 0, kind: input, shape index: {}]   ;;  %s2301_s1 = inlined_call_operand.hbm [shape: bf16[256,1024], index: 1, kind: input, shape index: {}]   ;;  %s2302_s2 = inlined_call_operand.vmem [shape: f32[1,1024], index: 2, kind: input, shape index: {}]   ;;  %s2303_s3 = inlined_call_operand.hbm [shape: bf16[1024,128], index: 3, kind: input, shape index: {}]   ;;  %s2304_s4 = inlined_call_operand.vmem [shape: f32[1,128], index: 4, kind: input, shape index: {}]   ;;  %s2305_s5 = inlined_call_operand.hbm [shape: f32[8,128], index: 5, kind: output, shape index: {}]  }
   0x1   :  { %11 = vsyncpa [#allocation6], 0 }
   0x2   :  { %12 = vsyncpa [#allocation4], 0  ;;  %s2181_s18 = smov [#allocation2]   ;;  %s2109_s22 = scalar_lea.hbm %s2301_s1, 16384 }
   0x3   :  { %s20_s19 = sshll.u32 %s2181_s18, 4  ;;  %p2110_p0 = scmp.ne.s32.totalorder %s2301_s1, %s2109_s22  ;;  %s21_s19 = int_to_ptr.vmem [resolvable:$true] %s20_s19 }
   0x4   :  { %p2113_p1 = scmp.lt.u32.totalorder %s2109_s22, %s2301_s1 }
   0x6   :  { %p2115_p2 = pnand %p2113_p1, %p2110_p0 }
   0x8   :  { %2118 = shalt.err (!%p2115_p2)
}
   0x9   :  { %s2119_s27 = scalar_lea.vmem %s21_s19, 16384  ;;  %p2124_p4 = scmp.lt.s32.totalorder %s21_s19, %s21_s19 }
   0xa   :  { %p2120_p3 = scmp.ne.s32.totalorder %s21_s19, %s2119_s27  ;;  %p2125_p5 = scmp.lt.s32.totalorder %s2119_s27, %s2119_s27 }
   0xc   :  { %p2126_p6 = por %p2125_p5, %p2124_p4 }
   0xe   :  { %p2127_p7 = pnand %p2126_p6, %p2120_p3 }
  0x10   :  { %2130 = shalt.err (!%p2127_p7)
}
  0x11   :  { %s2182_s28 = smov 512   ;;  %s2183_s29 = smov 32  }
  0x12   :  { %26 = dma.hbm_to_vmem [thread:$0]  %s2301_s1, 16384, %s21_s19, [#allocation3], %s2182_s28, %s2182_s28, %s2183_s29  }
  0x13   :  { %s2184_s7 = smov [#allocation5]   ;;  %s2131_s11 = scalar_lea.hbm %s2303_s3, 8192 }
  0x14   :  { %s34_s8 = sshll.u32 %s2184_s7, 4  ;;  %p2132_p8 = scmp.ne.s32.totalorder %s2303_s3, %s2131_s11  ;;  %s35_s8 = int_to_ptr.vmem [resolvable:$true] %s34_s8 }
  0x15   :  { %p2135_p9 = scmp.lt.u32.totalorder %s2131_s11, %s2303_s3 }
  0x17   :  { %p2137_p10 = pnand %p2135_p9, %p2132_p8 }
  0x19   :  { %2140 = shalt.err (!%p2137_p10)
}
  0x1a   :  { %s2141_s16 = scalar_lea.vmem %s35_s8, 8192  ;;  %p2146_p12 = scmp.lt.s32.totalorder %s35_s8, %s35_s8 }
  0x1b   :  { %p2142_p11 = scmp.ne.s32.totalorder %s35_s8, %s2141_s16  ;;  %p2147_p13 = scmp.lt.s32.totalorder %s2141_s16, %s2141_s16 }
  0x1d   :  { %p2148_p0 = por %p2147_p13, %p2146_p12 }
  0x1f   :  { %p2149_p1 = pnand %p2148_p0, %p2142_p11 }
  0x21   :  { %2152 = shalt.err (!%p2149_p1)
}
  0x22   :  { %s2185_s1 = smov 64   ;;  %s2186_s17 = smov 4  }
  0x23   :  { %40 = dma.hbm_to_vmem [thread:$0]  %s2303_s3, 8192, %s35_s8, [#allocation6], %s2185_s1, %s2185_s1, %s2186_s17  }
  0x24   :  { %2175 = dma.done.wait [#allocation3], 16384  }
  0x25   :  { %2176 = vsyncadd [#allocation3], 4294950912 }
  0x26   :  { %2177 = dma.done.wait [#allocation6], 8192  }
  0x27   :  { %2178 = vsyncadd [#allocation6], 4294959104  ;;  %v54_v0 = vld [vmem:[#allocation2] sm:$0xff]  ;;  %v55_v2 = vld [vmem:[#allocation2 + $0x8] sm:$0xff] }
  0x28   :  { %v58_v1 = vld [vmem:[#allocation2 + $0x20] sm:$0xff]  ;;  %v59_v4 = vld [vmem:[#allocation2 + $0x28] sm:$0xff] }
  0x29   :  { %v1754_v3 = vcombine.high %v54_v0, %v58_v1  ;;  %v1753_v5 = vcombine.low %v54_v0, %v58_v1  ;;  %v62_v6 = vld [vmem:[#allocation2 + $0x40] sm:$0xff]  ;;  %v1756_v8 = vcombine.high %v55_v2, %v59_v4  ;;  %v1755_v9 = vcombine.low %v55_v2, %v59_v4  ;;  %v63_v11 = vld [vmem:[#allocation2 + $0x48] sm:$0xff] }
  0x2a   :  { %v66_v7 = vld [vmem:[#allocation2 + $0x60] sm:$0xff]  ;;  %v67_v12 = vld [vmem:[#allocation2 + $0x68] sm:$0xff] }
  0x2b   :  { %v1762_v10 = vcombine.high %v62_v6, %v66_v7  ;;  %v70_v13 = vld [vmem:[#allocation2 + $0x80] sm:$0xff]  ;;  %864 = vmatprep.subr.bf16.mxu0 %v1754_v3  ;;  %v1764_v14 = vcombine.high %v63_v11, %v67_v12  ;;  %v71_v16 = vld [vmem:[#allocation2 + $0x88] sm:$0xff]  ;;  %905 = vmatprep.subr.bf16.mxu1 %v1756_v8  ;;  %v1761_v18 = vcombine.low %v62_v6, %v66_v7 }
  0x2c   :  { %v74_v15 = vld [vmem:[#allocation2 + $0xa0] sm:$0xff]  ;;  %v75_v17 = vld [vmem:[#allocation2 + $0xa8] sm:$0xff]  ;;  %865 = vmatpush1.bf16.msra.mxu0 %v1753_v5  ;;  %906 = vmatpush1.bf16.msra.mxu1 %v1755_v9  ;;  %v1763_v19 = vcombine.low %v63_v11, %v67_v12 }
  0x2d   :  { %866 = vmatprep.subr.bf16.mxu0 %v1762_v10  ;;  %v1770_v20 = vcombine.high %v70_v13, %v74_v15  ;;  %907 = vmatprep.subr.bf16.mxu1 %v1764_v14  ;;  %v1772_v21 = vcombine.high %v71_v16, %v75_v17  ;;  %v78_v22 = vld [vmem:[#allocation2 + $0xc0] sm:$0xff]  ;;  %v79_v24 = vld [vmem:[#allocation2 + $0xc8] sm:$0xff]  ;;  %v1769_v26 = vcombine.low %v70_v13, %v74_v15 }
  0x2e   :  { %v82_v23 = vld [vmem:[#allocation2 + $0xe0] sm:$0xff]  ;;  %v83_v25 = vld [vmem:[#allocation2 + $0xe8] sm:$0xff]  ;;  %v1771_v27 = vcombine.low %v71_v16, %v75_v17 }
  0x2f   :  { %v1778_v28 = vcombine.high %v78_v22, %v82_v23  ;;  %v1780_v29 = vcombine.high %v79_v24, %v83_v25  ;;  %v86_v30 = vld [vmem:[#allocation2 + $0x100] sm:$0xff]  ;;  %v87_v32 = vld [vmem:[#allocation2 + $0x108] sm:$0xff]  ;;  %v1777_v34 = vcombine.low %v78_v22, %v82_v23  ;;  %v1779_v35 = vcombine.low %v79_v24, %v83_v25 }
  0x30   :  { %867 = vmatpush1.bf16.msra.mxu0 %v1761_v18  ;;  %908 = vmatpush1.bf16.msra.mxu1 %v1763_v19  ;;  %v90_v31 = vld [vmem:[#allocation2 + $0x120] sm:$0xff]  ;;  %v91_v33 = vld [vmem:[#allocation2 + $0x128] sm:$0xff] }
  0x31   :  { %868 = vmatprep.subr.bf16.mxu0 %v1770_v20  ;;  %909 = vmatprep.subr.bf16.mxu1 %v1772_v21  ;;  %v1786_v36 = vcombine.high %v86_v30, %v90_v31  ;;  %v1788_v37 = vcombine.high %v87_v32, %v91_v33  ;;  %v94_v38 = vld [vmem:[#allocation2 + $0x140] sm:$0xff]  ;;  %v95_v40 = vld [vmem:[#allocation2 + $0x148] sm:$0xff]  ;;  %v1785_v42 = vcombine.low %v86_v30, %v90_v31 }
  0x32   :  { %v98_v39 = vld [vmem:[#allocation2 + $0x160] sm:$0xff]  ;;  %v99_v41 = vld [vmem:[#allocation2 + $0x168] sm:$0xff]  ;;  %v1787_v43 = vcombine.low %v87_v32, %v91_v33 }
  0x33   :  { %v1794_v44 = vcombine.high %v94_v38, %v98_v39  ;;  %v1796_v45 = vcombine.high %v95_v40, %v99_v41  ;;  %v102_v46 = vld [vmem:[#allocation2 + $0x180] sm:$0xff]  ;;  %v103_v48 = vld [vmem:[#allocation2 + $0x188] sm:$0xff]  ;;  %v1793_v50 = vcombine.low %v94_v38, %v98_v39  ;;  %v1795_v51 = vcombine.low %v95_v40, %v99_v41 }
  0x34   :  { %869 = vmatpush1.bf16.msra.mxu0 %v1769_v26  ;;  %910 = vmatpush1.bf16.msra.mxu1 %v1771_v27  ;;  %v106_v47 = vld [vmem:[#allocation2 + $0x1a0] sm:$0xff]  ;;  %v107_v49 = vld [vmem:[#allocation2 + $0x1a8] sm:$0xff] }
  0x35   :  { %870 = vmatprep.subr.bf16.mxu0 %v1778_v28  ;;  %911 = vmatprep.subr.bf16.mxu1 %v1780_v29  ;;  %v1802_v52 = vcombine.high %v102_v46, %v106_v47  ;;  %v51_v53 = vld [vmem:[%s2300_s0 + $0x8] sm:$0xff]  ;;  %v1804_v54 = vcombine.high %v103_v48, %v107_v49  ;;  %v110_v55 = vld [vmem:[#allocation2 + $0x1c0] sm:$0xff]  ;;  %v1801_v60 = vcombine.low %v102_v46, %v106_v47 }
  0x36   :  { %v114_v56 = vld [vmem:[#allocation2 + $0x1e0] sm:$0xff]  ;;  %v2245_v57 = vpack.c.bf16 %v51_v53, %v51_v53  ;;  %v111_v58 = vld [vmem:[#allocation2 + $0x1c8] sm:$0xff]  ;;  %v1803_v61 = vcombine.low %v103_v48, %v107_v49 }
  0x37   :  { %v115_v59 = vld [vmem:[#allocation2 + $0x1e8] sm:$0xff]  ;;  %v1810_v62 = vcombine.high %v110_v55, %v114_v56  ;;  %v118_v0 = vld [vmem:[#allocation2 + $0x200] sm:$0xff]  ;;  %v1809_v4 = vcombine.low %v110_v55, %v114_v56 }
  0x38   :  { %871 = vmatpush1.bf16.msra.mxu0 %v1777_v34  ;;  %912 = vmatpush1.bf16.msra.mxu1 %v1779_v35  ;;  %v1812_v63 = vcombine.high %v111_v58, %v115_v59  ;;  %v122_v1 = vld [vmem:[#allocation2 + $0x220] sm:$0xff]  ;;  %v119_v2 = vld [vmem:[#allocation2 + $0x208] sm:$0xff]  ;;  %v1811_v5 = vcombine.low %v111_v58, %v115_v59 }
  0x39   :  { %872 = vmatprep.subr.bf16.mxu0 %v1786_v36  ;;  %913 = vmatprep.subr.bf16.mxu1 %v1788_v37  ;;  %v123_v3 = vld [vmem:[#allocation2 + $0x228] sm:$0xff]  ;;  %v1818_v6 = vcombine.high %v118_v0, %v122_v1  ;;  %v126_v8 = vld [vmem:[#allocation2 + $0x240] sm:$0xff]  ;;  %v1817_v12 = vcombine.low %v118_v0, %v122_v1  ;;  %v60_v1 = vld [vmem:[#allocation2 + $0x30] sm:$0xff] }
  0x3a   :  { %896 = vmatprep.mubr.bf16.mxu0 %v2245_v57  ;;  %937 = vmatprep.mubr.bf16.mxu1 %v2245_v57  ;;  %v1820_v7 = vcombine.high %v119_v2, %v123_v3  ;;  %v130_v9 = vld [vmem:[#allocation2 + $0x260] sm:$0xff]  ;;  %v127_v10 = vld [vmem:[#allocation2 + $0x248] sm:$0xff]  ;;  %v1819_v13 = vcombine.low %v119_v2, %v123_v3 }
  0x3b   :  { %v131_v11 = vld [vmem:[#allocation2 + $0x268] sm:$0xff]  ;;  %v1826_v14 = vcombine.high %v126_v8, %v130_v9  ;;  %v134_v16 = vld [vmem:[#allocation2 + $0x280] sm:$0xff]  ;;  %v1825_v20 = vcombine.low %v126_v8, %v130_v9 }
  0x3c   :  { %873 = vmatpush1.bf16.msra.mxu0 %v1785_v42  ;;  %914 = vmatpush1.bf16.msra.mxu1 %v1787_v43  ;;  %v1828_v15 = vcombine.high %v127_v10, %v131_v11  ;;  %v138_v17 = vld [vmem:[#allocation2 + $0x2a0] sm:$0xff]  ;;  %v135_v18 = vld [vmem:[#allocation2 + $0x288] sm:$0xff]  ;;  %v1827_v21 = vcombine.low %v127_v10, %v131_v11  ;;  %v68_v10 = vld [vmem:[#allocation2 + $0x70] sm:$0xff] }
  0x3d   :  { %874 = vmatprep.subr.bf16.mxu0 %v1794_v44  ;;  %915 = vmatprep.subr.bf16.mxu1 %v1796_v45  ;;  %v139_v19 = vld [vmem:[#allocation2 + $0x2a8] sm:$0xff]  ;;  %v1834_v22 = vcombine.high %v134_v16, %v138_v17  ;;  %v142_v24 = vld [vmem:[#allocation2 + $0x2c0] sm:$0xff]  ;;  %v1833_v28 = vcombine.low %v134_v16, %v138_v17 }
  0x3e   :  { %v1836_v23 = vcombine.high %v135_v18, %v139_v19  ;;  %v146_v25 = vld [vmem:[#allocation2 + $0x2e0] sm:$0xff]  ;;  %v143_v26 = vld [vmem:[#allocation2 + $0x2c8] sm:$0xff]  ;;  %v1835_v29 = vcombine.low %v135_v18, %v139_v19  ;;  %v72_v18 = vld [vmem:[#allocation2 + $0x90] sm:$0xff] }
  0x3f   :  { %v147_v27 = vld [vmem:[#allocation2 + $0x2e8] sm:$0xff]  ;;  %v1842_v30 = vcombine.high %v142_v24, %v146_v25  ;;  %v150_v32 = vld [vmem:[#allocation2 + $0x300] sm:$0xff]  ;;  %v1841_v36 = vcombine.low %v142_v24, %v146_v25  ;;  %v80_v24 = vld [vmem:[#allocation2 + $0xd0] sm:$0xff] }
  0x40   :  { %875 = vmatpush1.bf16.msra.mxu0 %v1793_v50  ;;  %916 = vmatpush1.bf16.msra.mxu1 %v1795_v51  ;;  %v1844_v31 = vcombine.high %v143_v26, %v147_v27  ;;  %v154_v33 = vld [vmem:[#allocation2 + $0x320] sm:$0xff]  ;;  %v151_v34 = vld [vmem:[#allocation2 + $0x308] sm:$0xff]  ;;  %v1843_v38 = vcombine.low %v143_v26, %v147_v27  ;;  %v84_v25 = vld [vmem:[#allocation2 + $0xf0] sm:$0xff] }
  0x41   :  { %876 = vmatprep.subr.bf16.mxu0 %v1802_v52  ;;  %917 = vmatprep.subr.bf16.mxu1 %v1804_v54  ;;  %v155_v35 = vld [vmem:[#allocation2 + $0x328] sm:$0xff]  ;;  %v158_v37 = vld [vmem:[#allocation2 + $0x340] sm:$0xff]  ;;  %v1850_v39 = vcombine.high %v150_v32, %v154_v33  ;;  %v1849_v44 = vcombine.low %v150_v32, %v154_v33  ;;  %v88_v32 = vld [vmem:[#allocation2 + $0x110] sm:$0xff] }
  0x42   :  { %v162_v40 = vld [vmem:[#allocation2 + $0x360] sm:$0xff]  ;;  %v1852_v41 = vcombine.high %v151_v34, %v155_v35  ;;  %v159_v42 = vld [vmem:[#allocation2 + $0x348] sm:$0xff]  ;;  %v1851_v46 = vcombine.low %v151_v34, %v155_v35  ;;  %v92_v33 = vld [vmem:[#allocation2 + $0x130] sm:$0xff]  ;;  %v1782_v35 = vcombine.high %v80_v24, %v84_v25 }
  0x43   :  { %v163_v43 = vld [vmem:[#allocation2 + $0x368] sm:$0xff]  ;;  %v166_v45 = vld [vmem:[#allocation2 + $0x380] sm:$0xff]  ;;  %v1858_v47 = vcombine.high %v158_v37, %v162_v40  ;;  %v1857_v52 = vcombine.low %v158_v37, %v162_v40  ;;  %v93_v37 = vld [vmem:[#allocation2 + $0x138] sm:$0xff] }
  0x44   :  { %877 = vmatpush1.bf16.msra.mxu0 %v1801_v60  ;;  %918 = vmatpush1.bf16.msra.mxu1 %v1803_v61  ;;  %v170_v48 = vld [vmem:[#allocation2 + $0x3a0] sm:$0xff]  ;;  %v1860_v49 = vcombine.high %v159_v42, %v163_v43  ;;  %v167_v50 = vld [vmem:[#allocation2 + $0x388] sm:$0xff]  ;;  %v1859_v54 = vcombine.low %v159_v42, %v163_v43  ;;  %v96_v40 = vld [vmem:[#allocation2 + $0x150] sm:$0xff] }
  0x45   :  { %878 = vmatprep.subr.bf16.mxu0 %v1810_v62  ;;  %919 = vmatprep.subr.bf16.mxu1 %v1812_v63  ;;  %v171_v51 = vld [vmem:[#allocation2 + $0x3a8] sm:$0xff]  ;;  %v174_v53 = vld [vmem:[#allocation2 + $0x3c0] sm:$0xff]  ;;  %v1866_v55 = vcombine.high %v166_v45, %v170_v48  ;;  %v1865_v61 = vcombine.low %v166_v45, %v170_v48  ;;  %v56_v62 = vld [vmem:[#allocation2 + $0x10] sm:$0xff] }
  0x46   :  { %v178_v56 = vld [vmem:[#allocation2 + $0x3e0] sm:$0xff]  ;;  %v1868_v58 = vcombine.high %v167_v50, %v171_v51  ;;  %v175_v59 = vld [vmem:[#allocation2 + $0x3c8] sm:$0xff]  ;;  %v1867_v63 = vcombine.low %v167_v50, %v171_v51  ;;  %v1758_v9 = vcombine.high %v56_v62, %v60_v1  ;;  %v97_v43 = vld [vmem:[#allocation2 + $0x158] sm:$0xff] }
  0x47   :  { %v179_v60 = vld [vmem:[#allocation2 + $0x3e8] sm:$0xff]  ;;  %v1874_v0 = vcombine.high %v174_v53, %v178_v56  ;;  %v50_v3 = vld [vmem:[%s2300_s0] sm:$0xff]  ;;  %v108_v48 = vld [vmem:[#allocation2 + $0x1b0] sm:$0xff] }
  0x48   :  { %879 = vmatpush1.bf16.msra.mxu0 %v1809_v4  ;;  %920 = vmatpush1.bf16.msra.mxu1 %v1811_v5  ;;  %v1876_v2 = vcombine.high %v175_v59, %v179_v60  ;;  %v57_v4 = vld [vmem:[#allocation2 + $0x18] sm:$0xff]  ;;  %v1875_v8 = vcombine.low %v175_v59, %v179_v60 }
  0x49   :  { %880 = vmatprep.subr.bf16.mxu0 %v1818_v6  ;;  %921 = vmatprep.subr.bf16.mxu1 %v1820_v7  ;;  %v61_v5 = vld [vmem:[#allocation2 + $0x38] sm:$0xff]  ;;  %v1873_v6 = vcombine.low %v174_v53, %v178_v56  ;;  %v64_v7 = vld [vmem:[#allocation2 + $0x50] sm:$0xff] }
  0x4a   :  { %v1760_v11 = vcombine.high %v57_v4, %v61_v5  ;;  %v1759_v16 = vcombine.low %v57_v4, %v61_v5  ;;  %v1766_v17 = vcombine.high %v64_v7, %v68_v10  ;;  %v105_v51 = vld [vmem:[#allocation2 + $0x198] sm:$0xff]  ;;  %v116_v56 = vld [vmem:[#allocation2 + $0x1f0] sm:$0xff] }
  0x4b   :  { %v113_v60 = vld [vmem:[#allocation2 + $0x1d8] sm:$0xff] }
  0x4c   :  { %881 = vmatpush1.bf16.msra.mxu0 %v1817_v12  ;;  %922 = vmatpush1.bf16.msra.mxu1 %v1819_v13  ;;  %v65_v12 = vld [vmem:[#allocation2 + $0x58] sm:$0xff]  ;;  %v2252_v13 = vpack.c.bf16 %v50_v3, %v50_v3 }
  0x4d   :  { %882 = vmatprep.subr.bf16.mxu0 %v1826_v14  ;;  %923 = vmatprep.subr.bf16.mxu1 %v1828_v15  ;;  %v69_v14 = vld [vmem:[#allocation2 + $0x78] sm:$0xff]  ;;  %v1757_v15 = vcombine.low %v56_v62, %v60_v1  ;;  %v124_v1 = vld [vmem:[#allocation2 + $0x230] sm:$0xff] }
  0x4e   :  { %v1768_v19 = vcombine.high %v65_v12, %v69_v14  ;;  %v1767_v26 = vcombine.low %v65_v12, %v69_v14  ;;  %v121_v4 = vld [vmem:[#allocation2 + $0x218] sm:$0xff]  ;;  %v132_v12 = vld [vmem:[#allocation2 + $0x270] sm:$0xff] }
  0x4f   :  { %v125_v5 = vld [vmem:[#allocation2 + $0x238] sm:$0xff] }
  0x50   :  { %883 = vmatpush1.bf16.msra.mxu0 %v1825_v20  ;;  %924 = vmatpush1.bf16.msra.mxu1 %v1827_v21  ;;  %v76_v20 = vld [vmem:[#allocation2 + $0xb0] sm:$0xff]  ;;  %v73_v21 = vld [vmem:[#allocation2 + $0x98] sm:$0xff] }
  0x51   :  { %884 = vmatprep.subr.bf16.mxu0 %v1834_v22  ;;  %925 = vmatprep.subr.bf16.mxu1 %v1836_v23  ;;  %v77_v22 = vld [vmem:[#allocation2 + $0xb8] sm:$0xff]  ;;  %v1765_v23 = vcombine.low %v64_v7, %v68_v10  ;;  %v1774_v27 = vcombine.high %v72_v18, %v76_v20  ;;  %v1824_v10 = vcombine.high %v121_v4, %v125_v5 }
  0x52   :  { %v1775_v34 = vcombine.low %v73_v21, %v77_v22  ;;  %v129_v14 = vld [vmem:[#allocation2 + $0x258] sm:$0xff] }
  0x54   :  { %885 = vmatpush1.bf16.msra.mxu0 %v1833_v28  ;;  %926 = vmatpush1.bf16.msra.mxu1 %v1835_v29  ;;  %v81_v28 = vld [vmem:[#allocation2 + $0xd8] sm:$0xff] }
  0x55   :  { %886 = vmatprep.subr.bf16.mxu0 %v1842_v30  ;;  %927 = vmatprep.subr.bf16.mxu1 %v1844_v31  ;;  %v85_v29 = vld [vmem:[#allocation2 + $0xf8] sm:$0xff]  ;;  %v1776_v30 = vcombine.high %v73_v21, %v77_v22  ;;  %v1773_v31 = vcombine.low %v72_v18, %v76_v20  ;;  %v136_v20 = vld [vmem:[#allocation2 + $0x290] sm:$0xff] }
  0x56   :  { %v1783_v42 = vcombine.low %v81_v28, %v85_v29  ;;  %v140_v21 = vld [vmem:[#allocation2 + $0x2b0] sm:$0xff]  ;;  %v137_v22 = vld [vmem:[#allocation2 + $0x298] sm:$0xff] }
  0x58   :  { %887 = vmatpush1.bf16.msra.mxu0 %v1841_v36  ;;  %928 = vmatpush1.bf16.msra.mxu1 %v1843_v38  ;;  %v89_v36 = vld [vmem:[#allocation2 + $0x118] sm:$0xff]  ;;  %v1784_v38 = vcombine.high %v81_v28, %v85_v29  ;;  %v144_v28 = vld [vmem:[#allocation2 + $0x2d0] sm:$0xff] }
  0x59   :  { %888 = vmatprep.subr.bf16.mxu0 %v1850_v39  ;;  %929 = vmatprep.subr.bf16.mxu1 %v1852_v41  ;;  %v1781_v39 = vcombine.low %v80_v24, %v84_v25  ;;  %v100_v41 = vld [vmem:[#allocation2 + $0x170] sm:$0xff]  ;;  %v1792_v45 = vcombine.high %v89_v36, %v93_v37 }
  0x5a   :  { %v1798_v50 = vcombine.high %v96_v40, %v100_v41  ;;  %v148_v29 = vld [vmem:[#allocation2 + $0x2f0] sm:$0xff] }
  0x5c   :  { %889 = vmatpush1.bf16.msra.mxu0 %v1849_v44  ;;  %930 = vmatpush1.bf16.msra.mxu1 %v1851_v46  ;;  %v101_v44 = vld [vmem:[#allocation2 + $0x178] sm:$0xff]  ;;  %v1789_v46 = vcombine.low %v88_v32, %v92_v33 }
  0x5d   :  { %890 = vmatprep.subr.bf16.mxu0 %v1858_v47  ;;  %931 = vmatprep.subr.bf16.mxu1 %v1860_v49  ;;  %v104_v47 = vld [vmem:[#allocation2 + $0x190] sm:$0xff]  ;;  %v1791_v49 = vcombine.low %v89_v36, %v93_v37  ;;  %v1800_v53 = vcombine.high %v97_v43, %v101_v44 }
  0x5e   :  { %v1806_v59 = vcombine.high %v104_v47, %v108_v48  ;;  %v152_v36 = vld [vmem:[#allocation2 + $0x310] sm:$0xff] }
  0x5f   :  { %v156_v37 = vld [vmem:[#allocation2 + $0x330] sm:$0xff] }
  0x60   :  { %891 = vmatpush1.bf16.msra.mxu0 %v1857_v52  ;;  %932 = vmatpush1.bf16.msra.mxu1 %v1859_v54  ;;  %v109_v52 = vld [vmem:[#allocation2 + $0x1b8] sm:$0xff]  ;;  %v1797_v54 = vcombine.low %v96_v40, %v100_v41  ;;  %v1845_v40 = vcombine.low %v144_v28, %v148_v29 }
  0x61   :  { %892 = vmatprep.subr.bf16.mxu0 %v1866_v55  ;;  %933 = vmatprep.subr.bf16.mxu1 %v1868_v58  ;;  %v112_v55 = vld [vmem:[#allocation2 + $0x1d0] sm:$0xff]  ;;  %v1799_v58 = vcombine.low %v97_v43, %v101_v44  ;;  %v1808_v62 = vcombine.high %v105_v51, %v109_v52 }
  0x62   :  { %v1814_v3 = vcombine.high %v112_v55, %v116_v56  ;;  %v1813_v7 = vcombine.low %v112_v55, %v116_v56  ;;  %v160_v43 = vld [vmem:[#allocation2 + $0x350] sm:$0xff] }
  0x63   :  { %v164_v44 = vld [vmem:[#allocation2 + $0x370] sm:$0xff] }
  0x64   :  { %893 = vmatpush1.bf16.msra.mxu0 %v1865_v61  ;;  %934 = vmatpush1.bf16.msra.mxu1 %v1867_v63  ;;  %v117_v61 = vld [vmem:[#allocation2 + $0x1f8] sm:$0xff]  ;;  %v1805_v63 = vcombine.low %v104_v47, %v108_v48  ;;  %v1853_v47 = vcombine.low %v152_v36, %v156_v37  ;;  %v1861_v55 = vcombine.low %v160_v43, %v164_v44 }
  0x65   :  { %894 = vmatprep.subr.bf16.mxu0 %v1874_v0  ;;  %935 = vmatprep.subr.bf16.mxu1 %v1876_v2  ;;  %v120_v0 = vld [vmem:[#allocation2 + $0x210] sm:$0xff]  ;;  %v1807_v2 = vcombine.low %v105_v51, %v109_v52 }
  0x66   :  { %v168_v51 = vld [vmem:[#allocation2 + $0x390] sm:$0xff] }
  0x67   :  { %v172_v52 = vld [vmem:[#allocation2 + $0x3b0] sm:$0xff] }
  0x68   :  { %895 = vmatpush1.bf16.msra.mxu0 %v1873_v6  ;;  %936 = vmatpush1.bf16.msra.mxu1 %v1875_v8  ;;  %v1816_v6 = vcombine.high %v113_v60, %v117_v61  ;;  %v1815_v8 = vcombine.low %v113_v60, %v117_v61  ;;  %v176_v60 = vld [vmem:[#allocation2 + $0x3d0] sm:$0xff] }
  0x69   :  { %946 = vmatprep.subr.bf16.mxu0 %v1758_v9  ;;  %987 = vmatprep.subr.bf16.mxu1 %v1760_v11  ;;  %v1822_v9 = vcombine.high %v120_v0, %v124_v1  ;;  %v128_v11 = vld [vmem:[#allocation2 + $0x250] sm:$0xff] }
  0x6a   :  { %v1830_v18 = vcombine.high %v128_v11, %v132_v12  ;;  %v1829_v24 = vcombine.low %v128_v11, %v132_v12  ;;  %v180_v61 = vld [vmem:[#allocation2 + $0x3f0] sm:$0xff]  ;;  %v2046_v11 = vld [vmem:[#allocation5 + $0xc8] sm:$0xff]  }
  0x6b   :  { %897 = vmatmul.mubr.bf16.vlgmr.msra.gmra.mrb[0].mxu0 %v2252_v13  ;;  %938 = vmatmul.mubr.bf16.vlgmr.msra.gmra.mrb[0].mxu1 %v2252_v13  ;;  %v2047_v12 = vld [vmem:[#allocation5 + $0x8] sm:$0xff]  }
  0x6c   :  { %947 = vmatpush1.bf16.msra.mxu0 %v1757_v15  ;;  %988 = vmatpush1.bf16.msra.mxu1 %v1759_v16  ;;  %v133_v15 = vld [vmem:[#allocation2 + $0x278] sm:$0xff]  ;;  %v1821_v16 = vcombine.low %v120_v0, %v124_v1  ;;  %v1869_v0 = vcombine.low %v168_v51, %v172_v52 }
  0x6d   :  { %948 = vmatprep.subr.bf16.mxu0 %v1766_v17  ;;  %989 = vmatprep.subr.bf16.mxu1 %v1768_v19  ;;  %v1823_v17 = vcombine.low %v121_v4, %v125_v5  ;;  %v1832_v19 = vcombine.high %v129_v14, %v133_v15  ;;  %v1831_v25 = vcombine.low %v129_v14, %v133_v15  ;;  %v2048_v14 = vld [vmem:[#allocation5 + $0x88] sm:$0xff]   ;;  %v2049_v15 = vld [vmem:[#allocation5 + $0x50] sm:$0xff]  }
  0x6e   :  { %978 = vmatprep.mubr.bf16.mxu0 %v2245_v57  ;;  %1019 = vmatprep.mubr.bf16.mxu1 %v2245_v57  ;;  %v1790_v57 = vcombine.high %v88_v32, %v92_v33  ;;  %v1837_v32 = vcombine.low %v136_v20, %v140_v21  ;;  %v1877_v4 = vcombine.low %v176_v60, %v180_v61 }
  0x70   :  { %949 = vmatpush1.bf16.msra.mxu0 %v1765_v23  ;;  %990 = vmatpush1.bf16.msra.mxu1 %v1767_v26  ;;  %v141_v23 = vld [vmem:[#allocation2 + $0x2b8] sm:$0xff]  ;;  %v1838_v26 = vcombine.high %v136_v20, %v140_v21 }
  0x71   :  { %950 = vmatprep.subr.bf16.mxu0 %v1774_v27  ;;  %991 = vmatprep.subr.bf16.mxu1 %v1776_v30  ;;  %v1840_v27 = vcombine.high %v137_v22, %v141_v23  ;;  %v145_v30 = vld [vmem:[#allocation2 + $0x2d8] sm:$0xff]  ;;  %v1839_v33 = vcombine.low %v137_v22, %v141_v23  ;;  %v2057_v22 = vld [vmem:[#allocation5 + $0x60] sm:$0xff]  }
  0x72   :  { %v2054_v20 = vld [vmem:[#allocation5 + $0xd8] sm:$0xff]   ;;  %v2058_v23 = vld [vmem:[#allocation5 + $0xe0] sm:$0xff]  }
  0x73   :  { %v2055_v21 = vld [vmem:[#allocation5 + $0x18] sm:$0xff]  }
  0x74   :  { %951 = vmatpush1.bf16.msra.mxu0 %v1773_v31  ;;  %992 = vmatpush1.bf16.msra.mxu1 %v1775_v34  ;;  %v149_v31 = vld [vmem:[#allocation2 + $0x2f8] sm:$0xff]  ;;  %v1846_v34 = vcombine.high %v144_v28, %v148_v29  ;;  %v2063_v28 = vld [vmem:[#allocation5 + $0x28] sm:$0xff]  }
  0x75   :  { %952 = vmatprep.subr.bf16.mxu0 %v1782_v35  ;;  %993 = vmatprep.subr.bf16.mxu1 %v1784_v38  ;;  %v1848_v35 = vcombine.high %v145_v30, %v149_v31  ;;  %v153_v38 = vld [vmem:[#allocation2 + $0x318] sm:$0xff]  ;;  %v1847_v41 = vcombine.low %v145_v30, %v149_v31  ;;  %v2064_v29 = vld [vmem:[#allocation5 + $0xa8] sm:$0xff]   ;;  %v2065_v30 = vld [vmem:[#allocation5 + $0x70] sm:$0xff]  }
  0x76   :  { %v2066_v31 = vld [vmem:[#allocation5 + $0xf0] sm:$0xff]  }
  0x78   :  { %953 = vmatpush1.bf16.msra.mxu0 %v1781_v39  ;;  %994 = vmatpush1.bf16.msra.mxu1 %v1783_v42  ;;  %v157_v39 = vld [vmem:[#allocation2 + $0x338] sm:$0xff]  ;;  %v1854_v42 = vcombine.high %v152_v36, %v156_v37 }
  0x79   :  { %954 = vmatprep.subr.bf16.mxu0 %v1790_v57  ;;  %995 = vmatprep.subr.bf16.mxu1 %v1792_v45  ;;  %v1856_v57 = vcombine.high %v153_v38, %v157_v39  ;;  %v161_v45 = vld [vmem:[#allocation2 + $0x358] sm:$0xff]  ;;  %v1855_v48 = vcombine.low %v153_v38, %v157_v39  ;;  %v2073_v38 = vld [vmem:[#allocation5 + $0x140] sm:$0xff]  }
  0x7a   :  { %v2071_v36 = vld [vmem:[#allocation5 + $0x38] sm:$0xff]   ;;  %v2074_v39 = vld [vmem:[#allocation5 + $0x1c0] sm:$0xff]  }
  0x7b   :  { %v2072_v37 = vld [vmem:[#allocation5 + $0xb8] sm:$0xff]  }
  0x7c   :  { %955 = vmatpush1.bf16.msra.mxu0 %v1789_v46  ;;  %996 = vmatpush1.bf16.msra.mxu1 %v1791_v49  ;;  %v165_v46 = vld [vmem:[#allocation2 + $0x378] sm:$0xff]  ;;  %v1862_v49 = vcombine.high %v160_v43, %v164_v44 }
  0x7d   :  { %956 = vmatprep.subr.bf16.mxu0 %v1798_v50  ;;  %997 = vmatprep.subr.bf16.mxu1 %v1800_v53  ;;  %v1864_v50 = vcombine.high %v161_v45, %v165_v46  ;;  %v169_v53 = vld [vmem:[#allocation2 + $0x398] sm:$0xff]  ;;  %v1863_v56 = vcombine.low %v161_v45, %v165_v46 }
  0x80   :  { %957 = vmatpush1.bf16.msra.mxu0 %v1797_v54  ;;  %998 = vmatpush1.bf16.msra.mxu1 %v1799_v58  ;;  %v173_v54 = vld [vmem:[#allocation2 + $0x3b8] sm:$0xff]  ;;  %v1870_v58 = vcombine.high %v168_v51, %v172_v52 }
  0x81   :  { %958 = vmatprep.subr.bf16.mxu0 %v1806_v59  ;;  %999 = vmatprep.subr.bf16.mxu1 %v1808_v62  ;;  %v1872_v59 = vcombine.high %v169_v53, %v173_v54  ;;  %v177_v62 = vld [vmem:[#allocation2 + $0x3d8] sm:$0xff]  ;;  %v1871_v1 = vcombine.low %v169_v53, %v173_v54 }
  0x84   :  { %959 = vmatpush1.bf16.msra.mxu0 %v1805_v63  ;;  %1000 = vmatpush1.bf16.msra.mxu1 %v1807_v2  ;;  %v181_v63 = vld [vmem:[#allocation2 + $0x3f8] sm:$0xff]  ;;  %v1878_v2 = vcombine.high %v176_v60, %v180_v61 }
  0x85   :  { %960 = vmatprep.subr.bf16.mxu0 %v1814_v3  ;;  %1001 = vmatprep.subr.bf16.mxu1 %v1816_v6  ;;  %v1880_v3 = vcombine.high %v177_v62, %v181_v63  ;;  %v1879_v5 = vcombine.low %v177_v62, %v181_v63  ;;  %v2041_v6 = vld [vmem:[#allocation5 + $0x40] sm:$0xff]  }
  0x88   :  { %961 = vmatpush1.bf16.msra.mxu0 %v1813_v7  ;;  %1002 = vmatpush1.bf16.msra.mxu1 %v1815_v8  ;;  %v2042_v7 = vld [vmem:[#allocation5 + $0xc0] sm:$0xff]  }
  0x89   :  { %962 = vmatprep.subr.bf16.mxu0 %v1822_v9  ;;  %1003 = vmatprep.subr.bf16.mxu1 %v1824_v10  ;;  %v2043_v8 = vld [vmem:[#allocation5] sm:$0xff]   ;;  %v2045_v10 = vld [vmem:[#allocation5 + $0x48] sm:$0xff]  }
  0x8a   :  { %v2044_v9 = vld [vmem:[#allocation5 + $0x80] sm:$0xff]  }
  0x8c   :  { %963 = vmatpush1.bf16.msra.mxu0 %v1821_v16  ;;  %1004 = vmatpush1.bf16.msra.mxu1 %v1823_v17  ;;  %v2050_v16 = vld [vmem:[#allocation5 + $0xd0] sm:$0xff]  }
  0x8d   :  { %964 = vmatprep.subr.bf16.mxu0 %v1830_v18  ;;  %1005 = vmatprep.subr.bf16.mxu1 %v1832_v19  ;;  %v2051_v17 = vld [vmem:[#allocation5 + $0x10] sm:$0xff]   ;;  %v2053_v19 = vld [vmem:[#allocation5 + $0x58] sm:$0xff]  }
  0x8e   :  { %v2052_v18 = vld [vmem:[#allocation5 + $0x90] sm:$0xff]  }
  0x90   :  { %965 = vmatpush1.bf16.msra.mxu0 %v1829_v24  ;;  %1006 = vmatpush1.bf16.msra.mxu1 %v1831_v25  ;;  %v2059_v24 = vld [vmem:[#allocation5 + $0x20] sm:$0xff]  }
  0x91   :  { %966 = vmatprep.subr.bf16.mxu0 %v1838_v26  ;;  %1007 = vmatprep.subr.bf16.mxu1 %v1840_v27  ;;  %v2060_v25 = vld [vmem:[#allocation5 + $0xa0] sm:$0xff]   ;;  %v2061_v26 = vld [vmem:[#allocation5 + $0x68] sm:$0xff]  }
  0x92   :  { %v2062_v27 = vld [vmem:[#allocation5 + $0xe8] sm:$0xff]  }
  0x94   :  { %967 = vmatpush1.bf16.msra.mxu0 %v1837_v32  ;;  %1008 = vmatpush1.bf16.msra.mxu1 %v1839_v33  ;;  %v2067_v32 = vld [vmem:[#allocation5 + $0x30] sm:$0xff]  }
  0x95   :  { %968 = vmatprep.subr.bf16.mxu0 %v1846_v34  ;;  %1009 = vmatprep.subr.bf16.mxu1 %v1848_v35  ;;  %v2068_v33 = vld [vmem:[#allocation5 + $0xb0] sm:$0xff]   ;;  %v2069_v34 = vld [vmem:[#allocation5 + $0x78] sm:$0xff]  }
  0x96   :  { %v2070_v35 = vld [vmem:[#allocation5 + $0xf8] sm:$0xff]  }
  0x98   :  { %969 = vmatpush1.bf16.msra.mxu0 %v1845_v40  ;;  %1010 = vmatpush1.bf16.msra.mxu1 %v1847_v41  ;;  %v184_v40 = vlaneseq }
  0x99   :  { %970 = vmatprep.subr.bf16.mxu0 %v1854_v42  ;;  %1011 = vmatprep.subr.bf16.mxu1 %v1856_v57  ;;  %v2267_v57 = vld [vmem:[%s2302_s2] sm:$0xff] }
  0x9a   :  { %v2261_v41 = vshrl.u32 %v184_v40, 7 }
  0x9c   :  { %971 = vmatpush1.bf16.msra.mxu0 %v1853_v47  ;;  %1012 = vmatpush1.bf16.msra.mxu1 %v1855_v48  ;;  %v186_v42 = vsub.s32 0, %v2261_v41  ;;  %v194_v43 = vsub.s32 2, %v2261_v41  ;;  %v190_v44 = vsub.s32 1, %v2261_v41  ;;  %v198_v45 = vsub.s32 3, %v2261_v41 }
  0x9d   :  { %972 = vmatprep.subr.bf16.mxu0 %v1862_v49  ;;  %1013 = vmatprep.subr.bf16.mxu1 %v1864_v50 }
  0x9e   :  { %v187_v46 = vrot.slane %v2267_v57, %v186_v42  ;;  %v195_v47 = vrot.slane %v2267_v57, %v194_v43  ;;  %v191_v48 = vrot.slane %v2267_v57, %v190_v44  ;;  %v199_v49 = vrot.slane %v2267_v57, %v198_v45 }
  0x9f   :  { %v214_v42 = vsub.s32 7, %v2261_v41 }
  0xa0   :  { %973 = vmatpush1.bf16.msra.mxu0 %v1861_v55  ;;  %1014 = vmatpush1.bf16.msra.mxu1 %v1863_v56 }
  0xa1   :  { %974 = vmatprep.subr.bf16.mxu0 %v1870_v58  ;;  %1015 = vmatprep.subr.bf16.mxu1 %v1872_v59 }
  0xa4   :  { %975 = vmatpush1.bf16.msra.mxu0 %v1869_v0  ;;  %1016 = vmatpush1.bf16.msra.mxu1 %v1871_v1 }
  0xa5   :  { %976 = vmatprep.subr.bf16.mxu0 %v1878_v2  ;;  %1017 = vmatprep.subr.bf16.mxu1 %v1880_v3 }
  0xa8   :  { %977 = vmatpush1.bf16.msra.mxu0 %v1877_v4  ;;  %1018 = vmatpush1.bf16.msra.mxu1 %v1879_v5 }
  0xa9   :  { %1946 = vmatprep.subr.bf16.mxu0 %v2041_v6  ;;  %1968 = vmatprep.subr.bf16.mxu1 %v2042_v7  ;;  %v2075_v6 = vld [vmem:[#allocation5 + $0x100] sm:$0xff]  }
  0xab   :  { %979 = vmatmul.mubr.bf16.vlgmr.msra.gmra.mrb[4].mxu0 %v2252_v13  ;;  %1020 = vmatmul.mubr.bf16.vlgmr.msra.gmra.mrb[4].mxu1 %v2252_v13  ;;  %v2056_v13 = vld [vmem:[#allocation5 + $0x98] sm:$0xff]  }
  0xac   :  { %1947 = vmatpush3.bf16.msra.mxu0 %v2043_v8  ;;  %1969 = vmatpush3.bf16.msra.mxu1 %v2044_v9  ;;  %v2076_v8 = vld [vmem:[#allocation5 + $0x180] sm:$0xff]   ;;  %v2077_v9 = vld [vmem:[#allocation5 + $0x148] sm:$0xff]  }
  0xad   :  { %1948 = vmatprep.subr.bf16.mxu0 %v2045_v10  ;;  %1970 = vmatprep.subr.bf16.mxu1 %v2046_v11  ;;  %v2078_v10 = vld [vmem:[#allocation5 + $0x1c8] sm:$0xff]  }
  0xae   :  { %v2079_v11 = vld [vmem:[#allocation5 + $0x108] sm:$0xff]  }
  0xb0   :  { %1949 = vmatpush3.bf16.msra.mxu0 %v2047_v12  ;;  %1971 = vmatpush3.bf16.msra.mxu1 %v2048_v14  ;;  %v2080_v12 = vld [vmem:[#allocation5 + $0x188] sm:$0xff]   ;;  %v2081_v14 = vld [vmem:[#allocation5 + $0x150] sm:$0xff]  }
  0xb1   :  { %1950 = vmatprep.subr.bf16.mxu0 %v2049_v15  ;;  %1972 = vmatprep.subr.bf16.mxu1 %v2050_v16  ;;  %v2082_v15 = vld [vmem:[#allocation5 + $0x1d0] sm:$0xff]  }
  0xb2   :  { %v2083_v16 = vld [vmem:[#allocation5 + $0x110] sm:$0xff]  }
  0xb4   :  { %1951 = vmatpush3.bf16.msra.mxu0 %v2051_v17  ;;  %1973 = vmatpush3.bf16.msra.mxu1 %v2052_v18  ;;  %v2084_v17 = vld [vmem:[#allocation5 + $0x190] sm:$0xff]   ;;  %v2085_v18 = vld [vmem:[#allocation5 + $0x158] sm:$0xff]  }
  0xb5   :  { %1952 = vmatprep.subr.bf16.mxu0 %v2053_v19  ;;  %1974 = vmatprep.subr.bf16.mxu1 %v2054_v20  ;;  %v2086_v19 = vld [vmem:[#allocation5 + $0x1d8] sm:$0xff]  }
  0xb6   :  { %v2087_v20 = vld [vmem:[#allocation5 + $0x118] sm:$0xff]  }
  0xb8   :  { %1953 = vmatpush3.bf16.msra.mxu0 %v2055_v21  ;;  %1975 = vmatpush3.bf16.msra.mxu1 %v2056_v13  ;;  %v2088_v21 = vld [vmem:[#allocation5 + $0x198] sm:$0xff]   ;;  %v2089_v13 = vld [vmem:[#allocation5 + $0x160] sm:$0xff]  }
  0xb9   :  { %1954 = vmatprep.subr.bf16.mxu0 %v2057_v22  ;;  %1976 = vmatprep.subr.bf16.mxu1 %v2058_v23  ;;  %v2090_v22 = vld [vmem:[#allocation5 + $0x1e0] sm:$0xff]  }
  0xba   :  { %v2091_v23 = vld [vmem:[#allocation5 + $0x120] sm:$0xff]  }
  0xbc   :  { %1955 = vmatpush3.bf16.msra.mxu0 %v2059_v24  ;;  %1977 = vmatpush3.bf16.msra.mxu1 %v2060_v25  ;;  %v2092_v24 = vld [vmem:[#allocation5 + $0x1a0] sm:$0xff]   ;;  %v2093_v25 = vld [vmem:[#allocation5 + $0x168] sm:$0xff]  }
  0xbd   :  { %1956 = vmatprep.subr.bf16.mxu0 %v2061_v26  ;;  %1978 = vmatprep.subr.bf16.mxu1 %v2062_v27  ;;  %v2094_v26 = vld [vmem:[#allocation5 + $0x1e8] sm:$0xff]  }
  0xbe   :  { %v2095_v27 = vld [vmem:[#allocation5 + $0x128] sm:$0xff]  }
  0xc0   :  { %1957 = vmatpush3.bf16.msra.mxu0 %v2063_v28  ;;  %1979 = vmatpush3.bf16.msra.mxu1 %v2064_v29  ;;  %v2096_v28 = vld [vmem:[#allocation5 + $0x1a8] sm:$0xff]   ;;  %v2097_v29 = vld [vmem:[#allocation5 + $0x170] sm:$0xff]  }
  0xc1   :  { %1958 = vmatprep.subr.bf16.mxu0 %v2065_v30  ;;  %1980 = vmatprep.subr.bf16.mxu1 %v2066_v31  ;;  %v2098_v30 = vld [vmem:[#allocation5 + $0x1f0] sm:$0xff]  }
  0xc2   :  { %v2099_v31 = vld [vmem:[#allocation5 + $0x130] sm:$0xff]  }
  0xc4   :  { %1959 = vmatpush3.bf16.msra.mxu0 %v2067_v32  ;;  %1981 = vmatpush3.bf16.msra.mxu1 %v2068_v33  ;;  %v2100_v32 = vld [vmem:[#allocation5 + $0x1b0] sm:$0xff]   ;;  %v2101_v33 = vld [vmem:[#allocation5 + $0x178] sm:$0xff]  }
  0xc5   :  { %1960 = vmatprep.subr.bf16.mxu0 %v2069_v34  ;;  %1982 = vmatprep.subr.bf16.mxu1 %v2070_v35  ;;  %v2102_v34 = vld [vmem:[#allocation5 + $0x1f8] sm:$0xff]  }
  0xc6   :  { %v2103_v35 = vld [vmem:[#allocation5 + $0x138] sm:$0xff]  }
  0xc8   :  { %1961 = vmatpush3.bf16.msra.mxu0 %v2071_v36  ;;  %1983 = vmatpush3.bf16.msra.mxu1 %v2072_v37  ;;  %v2104_v36 = vld [vmem:[#allocation5 + $0x1b8] sm:$0xff]   ;;  %v202_v37 = vsub.s32 4, %v2261_v41 }
  0xc9   :  { %1990 = vmatprep.subr.bf16.mxu0 %v2073_v38  ;;  %2012 = vmatprep.subr.bf16.mxu1 %v2074_v39  ;;  %v210_v38 = vsub.s32 6, %v2261_v41  ;;  %v206_v39 = vsub.s32 5, %v2261_v41 }
  0xca   :  { %v203_v43 = vrot.slane %v2267_v57, %v202_v37 }
  0xcb   :  { %v211_v44 = vrot.slane %v2267_v57, %v210_v38  ;;  %v207_v45 = vrot.slane %v2267_v57, %v206_v39 }
 0x13e   :  { %v898_v50 = vpop.f32.mrb[0].mxu0  ;;  %v939_v52 = vpop.f32.mrb[0].mxu1 }
 0x13f   :  { %v899_v51 = vadd.f32 %v898_v50, %v187_v46  ;;  %v900_v53 = vpop.f32.mrb[1].mxu0  ;;  %v940_v54 = vadd.f32 %v939_v52, %v195_v47  ;;  %v941_v56 = vpop.f32.mrb[1].mxu1  ;;  %v215_v46 = vrot.slane %v2267_v57, %v214_v42 }
 0x140   :  { %v901_v55 = vadd.f32 %v900_v53, %v191_v48  ;;  %v902_v58 = vpop.f32.mrb[2].mxu0  ;;  %v942_v60 = vadd.f32 %v941_v56, %v199_v49  ;;  %v943_v61 = vpop.f32.mrb[2].mxu1 }
 0x141   :  { %v1028_v59 = vmax.f32 %v899_v51, 0.0  ;;  %v903_v62 = vpop.f32.mrb[3].mxu0  ;;  %v1030_v63 = vmax.f32 %v940_v54, 0.0  ;;  %v944_v1 = vpop.f32.mrb[3].mxu1 }
 0x142   :  { %v1029_v0 = vmax.f32 %v901_v55, 0.0  ;;  %v1031_v3 = vmax.f32 %v942_v60, 0.0 }
 0x143   :  { %v1036_v2 = vpack.c.bf16 %v1028_v59, %v1028_v59  ;;  %v1038_v4 = vpack.c.bf16 %v1030_v63, %v1030_v63 }
 0x144   :  { %v1037_v5 = vpack.c.bf16 %v1029_v0, %v1029_v0  ;;  %v1039_v7 = vpack.c.bf16 %v1031_v3, %v1031_v3 }
 0x146   :  { %1595 = vmatprep.mubr.bf16.mxu0 %v1037_v5  ;;  %1635 = vmatprep.mubr.bf16.mxu1 %v1039_v7 }
 0x147   :  { %1596 = vmatmul.mubr.bf16.vlgmr.msra.gmra.mrb[8].mxu0 %v1036_v2  ;;  %1636 = vmatmul.mubr.bf16.vlgmr.msra.gmra.mrb[8].mxu1 %v1038_v4  ;;  %v1881_v4 = vld [vmem:[%s2304_s4] ss:$0 sm:$0xff]  ;;  %s2187_s4 = smov [#allocation7]  }
 0x148   :  { %1991 = vmatpush3.bf16.msra.mxu0 %v2075_v6  ;;  %2013 = vmatpush3.bf16.msra.mxu1 %v2076_v8  ;;  %s1743_s25 = sshll.u32 %s2187_s4, 4  ;;  %s1744_s25 = int_to_ptr.vmem [resolvable:$true] %s1743_s25 }
 0x149   :  { %1992 = vmatprep.subr.bf16.mxu0 %v2077_v9  ;;  %2014 = vmatprep.subr.bf16.mxu1 %v2078_v10  ;;  %s2153_s26 = scalar_lea.vmem %s1744_s25, 128  ;;  %p2158_p3 = scmp.lt.s32.totalorder %s1744_s25, %s1744_s25 }
 0x14a   :  { %p2154_p2 = scmp.ne.s32.totalorder %s1744_s25, %s2153_s26  ;;  %p2159_p4 = scmp.lt.s32.totalorder %s2153_s26, %s2153_s26 }
 0x14c   :  { %1993 = vmatpush3.bf16.msra.mxu0 %v2079_v11  ;;  %2015 = vmatpush3.bf16.msra.mxu1 %v2080_v12  ;;  %p2160_p5 = por %p2159_p4, %p2158_p3 }
 0x14d   :  { %1994 = vmatprep.subr.bf16.mxu0 %v2081_v14  ;;  %2016 = vmatprep.subr.bf16.mxu1 %v2082_v15 }
 0x14e   :  { %p2161_p6 = pnand %p2160_p5, %p2154_p2 }
 0x150   :  { %1995 = vmatpush3.bf16.msra.mxu0 %v2083_v16  ;;  %2017 = vmatpush3.bf16.msra.mxu1 %v2084_v17 }
 0x151   :  { %1996 = vmatprep.subr.bf16.mxu0 %v2085_v18  ;;  %2018 = vmatprep.subr.bf16.mxu1 %v2086_v19  ;;  %v1724_v19 = vand.u32 127, %v184_v40 }
 0x153   :  { %vm1725_vm0 = vcmp.lt.s32.totalorder %v1724_v19, 10 }
 0x154   :  { %1997 = vmatpush3.bf16.msra.mxu0 %v2087_v20  ;;  %2019 = vmatpush3.bf16.msra.mxu1 %v2088_v21 }
 0x155   :  { %1998 = vmatprep.subr.bf16.mxu0 %v2089_v13  ;;  %2020 = vmatprep.subr.bf16.mxu1 %v2090_v22 }
 0x158   :  { %1999 = vmatpush3.bf16.msra.mxu0 %v2091_v23  ;;  %2021 = vmatpush3.bf16.msra.mxu1 %v2092_v24 }
 0x159   :  { %2000 = vmatprep.subr.bf16.mxu0 %v2093_v25  ;;  %2022 = vmatprep.subr.bf16.mxu1 %v2094_v26 }
 0x15c   :  { %2001 = vmatpush3.bf16.msra.mxu0 %v2095_v27  ;;  %2023 = vmatpush3.bf16.msra.mxu1 %v2096_v28 }
 0x15d   :  { %2002 = vmatprep.subr.bf16.mxu0 %v2097_v29  ;;  %2024 = vmatprep.subr.bf16.mxu1 %v2098_v30 }
 0x160   :  { %2003 = vmatpush3.bf16.msra.mxu0 %v2099_v31  ;;  %2025 = vmatpush3.bf16.msra.mxu1 %v2100_v32 }
 0x161   :  { %2004 = vmatprep.subr.bf16.mxu0 %v2101_v33  ;;  %2026 = vmatprep.subr.bf16.mxu1 %v2102_v34 }
 0x164   :  { %2005 = vmatpush3.bf16.msra.mxu0 %v2103_v35  ;;  %2027 = vmatpush3.bf16.msra.mxu1 %v2104_v36 }
 0x17e   :  { %v980_v47 = vpop.f32.mrb[4].mxu0  ;;  %v1021_v49 = vpop.f32.mrb[4].mxu1 }
 0x17f   :  { %v981_v48 = vadd.f32 %v980_v47, %v203_v43  ;;  %v982_v50 = vpop.f32.mrb[5].mxu0  ;;  %v1022_v51 = vadd.f32 %v1021_v49, %v211_v44  ;;  %v1023_v53 = vpop.f32.mrb[5].mxu1 }
 0x180   :  { %v983_v52 = vadd.f32 %v982_v50, %v207_v45  ;;  %v984_v54 = vpop.f32.mrb[6].mxu0  ;;  %v1024_v56 = vadd.f32 %v1023_v53, %v215_v46  ;;  %v1025_v58 = vpop.f32.mrb[6].mxu1 }
 0x181   :  { %v1032_v55 = vmax.f32 %v981_v48, 0.0  ;;  %v985_v41 = vpop.f32.mrb[7].mxu0  ;;  %v1034_v59 = vmax.f32 %v1022_v51, 0.0  ;;  %v1026_v61 = vpop.f32.mrb[7].mxu1 }
 0x182   :  { %v1033_v60 = vmax.f32 %v983_v52, 0.0  ;;  %v1035_v62 = vmax.f32 %v1024_v56, 0.0 }
 0x183   :  { %v1042_v63 = vpack.c.bf16 %v1034_v59, %v1034_v59  ;;  %v1040_v1 = vpack.c.bf16 %v1032_v55, %v1032_v55 }
 0x184   :  { %v1041_v0 = vpack.c.bf16 %v1033_v60, %v1033_v60  ;;  %v1043_v57 = vpack.c.bf16 %v1035_v62, %v1035_v62 }
 0x186   :  { %1675 = vmatprep.mubr.bf16.mxu0 %v1041_v0  ;;  %1715 = vmatprep.mubr.bf16.mxu1 %v1043_v57 }
 0x187   :  { %1676 = vmatmul.mubr.bf16.vlgmr.msra.gmra.mrb[12].mxu0 %v1040_v1  ;;  %1716 = vmatmul.mubr.bf16.vlgmr.msra.gmra.mrb[12].mxu1 %v1042_v63 }
 0x21a   :  { %v1962_v2 = vpop.f32.mrb[8].mxu0  ;;  %v1984_v3 = vpop.f32.mrb[8].mxu1 }
 0x21b   :  { %v1963_v5 = vpop.f32.mrb[9].mxu0  ;;  %v1985_v7 = vpop.f32.mrb[9].mxu1 }
 0x21c   :  { %v1964_v6 = vadd.f32 %v1963_v5, %v1962_v2  ;;  %v1965_v8 = vpop.f32.mrb[10].mxu0  ;;  %v1986_v9 = vadd.f32 %v1985_v7, %v1984_v3  ;;  %v1987_v10 = vpop.f32.mrb[10].mxu1 }
 0x21d   :  { %v1966_v11 = vpop.f32.mrb[11].mxu0  ;;  %v1988_v14 = vpop.f32.mrb[11].mxu1 }
 0x21e   :  { %v1598_v12 = vadd.f32 %v1964_v6, %v1881_v4 }
 0x220   :  { %v1638_v15 = vadd.f32 %v1986_v9, %v1598_v12 }
 0x25a   :  { %v2006_v16 = vpop.f32.mrb[12].mxu0  ;;  %v2028_v17 = vpop.f32.mrb[12].mxu1 }
 0x25b   :  { %v2007_v18 = vpop.f32.mrb[13].mxu0  ;;  %v2029_v21 = vpop.f32.mrb[13].mxu1 }
 0x25c   :  { %v2008_v20 = vadd.f32 %v2007_v18, %v2006_v16  ;;  %v2009_v13 = vpop.f32.mrb[14].mxu0  ;;  %v2030_v22 = vadd.f32 %v2029_v21, %v2028_v17  ;;  %v2031_v23 = vpop.f32.mrb[14].mxu1 }
 0x25d   :  { %v2010_v24 = vpop.f32.mrb[15].mxu0  ;;  %v2032_v26 = vpop.f32.mrb[15].mxu1 }
 0x25e   :  { %v1678_v25 = vadd.f32 %v2008_v20, %v1638_v15 }
 0x260   :  { %v1718_v27 = vadd.f32 %v2030_v22, %v1678_v25 }
 0x262   :  { %v1726_v28 = vsel %vm1725_vm0, %v1718_v27, -inf }
 0x263   :  { %1727 = vmax.xlane.f32.xlu0 %v1726_v28 }
 0x2f0   :  { %v1728_v29 = vpop.xlane.xlu0 %1727 }
 0x2f1   :  { %v1729_v30 = vsub.f32 %v1726_v28, %v1728_v29 }
 0x2f3   :  { %v1730_v31 = vmul.f32 1.442695, %v1729_v30 }
 0x2f5   :  { %2105 = vpow2.f32 %v1730_v31 }
 0x2ff   :  { %v2106_v32 = vpop.eup %2105 }
 0x300   :  { %1732 = vadd.xlane.f32.xlu0 %v2106_v32 }
 0x38d   :  { %v1733_v33 = vpop.xlane.xlu0 %1732 }
 0x38e   :  { %2107 = vrcp.f32 %v1733_v33 }
 0x398   :  { %v2108_v40 = vpop.eup %2107 }
 0x399   :  { %v1735_v34 = vmul.f32 %v2108_v40, %v2106_v32 }
 0x39b   :  { %1736 = vst [vmem:[#allocation7] sm:$0xff] %v1735_v34 }
 0x39c   :  { %2164 = shalt.err (!%p2161_p6)
}
 0x39d   :  { %s2165_s29 = scalar_lea.hbm %s2305_s5, 128 }
 0x39e   :  { %p2166_p7 = scmp.ne.s32.totalorder %s2305_s5, %s2165_s29  ;;  %p2169_p8 = scmp.lt.u32.totalorder %s2165_s29, %s2305_s5 }
 0x3a0   :  { %p2171_p9 = pnand %p2169_p8, %p2166_p7 }
 0x3a2   :  { %2174 = shalt.err (!%p2171_p9)
}
 0x3a3   :  { %1746 = dma.vmem_to_hbm [thread:$0]  %s1744_s25, 128, %s2305_s5, [#allocation4]  }
 0x3a4   :  { %2179 = dma.done.wait [#allocation4], 128  }
 0x3a5   :  { %2180 = vsyncadd [#allocation4], 4294967168 }
 0x3a6   :  { %1750 = vsyncpa [#allocation3], 1 }
 0x3a7   :  { %1751 = vsyncpa [#allocation6], 1 }
 0x3a8   :  { %1752 = vsyncpa [#allocation4], 1 }

</bundles_post_ra>
